<compile_context>
chip_gen: v5e
topology: v5e:2x2
jax: 0.10.0
libtpu: 0.0.40
codegen_flags: <defaults>
</compile_context>

<pallas_src>
import jax
import jax.numpy as jnp
from jax.experimental import pallas as pl
from jax.experimental.pallas import tpu as pltpu

IN_FEATURES = 128
OUT_FEATURES = 1
MAX_BLOCK_ROWS = 8192   # 4 MiB f32 x-tile; x2 double-buffering ~8 MiB VMEM
MIN_SPLIT_ROWS = 256    # below this: single block; above: >=2 grid steps


def _round_up(n: int, m: int) -> int:
    return ((n + m - 1) // m) * m


def _sublane_multiple(dtype) -> int:
    # f32 -> 8, bf16 -> 16, int8/fp8 -> 32 (sub-32-bit dtypes pack along sublanes)
    return max(8, 32 // dtype.itemsize)


def dhead_kernel(x_ref, w_ref, b_ref, o_ref):
    x = x_ref[...]                                # (tb, 128)
    w = w_ref[...].astype(x.dtype)                # (1, 128); tiny, match x for the MXU
    # NT matmul on the MXU: (1,128) . (tb,128)^T -> (1, tb). The lane-dense
    # output tile stores with full-lane unmasked vst (the big lever per review).
    logits = jax.lax.dot_general(
        w, x, (((1,), (1,)), ((), ())),
        precision=jax.lax.Precision.HIGHEST,
        preferred_element_type=jnp.float32)       # (1, tb) f32
    logits = logits + b_ref[0]                    # scalar bias from SMEM
    o_ref[...] = jax.nn.sigmoid(logits).astype(o_ref.dtype)


def _pick_tile(batch: int, sublane: int) -> int:
    rounded = _round_up(batch, sublane)
    if rounded < MIN_SPLIT_ROWS:
        # Single block covering the sublane-rounded batch. The (1, tb) output
        # block then equals the full (padded) output dims, so tb < 128 is legal.
        return rounded
    # >= 2 grid steps (lets v7x megacore shard the "parallel" batch axis) and a
    # multiple of 128 so the lane-dense (1, tb) output block is always legal.
    return min(MAX_BLOCK_ROWS, _round_up(pl.cdiv(rounded, 2), 128))


def dhead_forward(x, w, b):
    """DHead forward: sigmoid(x @ w.T + b). x:(B,128), w:(1,128), b:(1,) -> (B,1) f32."""
    B, F = x.shape
    assert F == IN_FEATURES
    assert w.shape == (OUT_FEATURES, IN_FEATURES)
    assert b.shape == (OUT_FEATURES,)

    tb = _pick_tile(B, _sublane_multiple(x.dtype))
    num_blocks = pl.cdiv(B, tb)
    padded_b = num_blocks * tb   # only the tiny output is padded; x is never copied

    cost = pl.CostEstimate(
        flops=2 * B * IN_FEATURES,
        transcendentals=B,
        bytes_accessed=(B * IN_FEATURES * x.dtype.itemsize   # read x (dominant)
                        + B * 4                              # write out
                        + IN_FEATURES * 4 + 4),              # w + b
    )

    out = pl.pallas_call(
        dhead_kernel,
        out_shape=jax.ShapeDtypeStruct((1, padded_b), jnp.float32),
        grid=(num_blocks,),
        in_specs=[
            # Streamed x tiles (double-buffered); Pallas masks the partial tail block.
            pl.BlockSpec((tb, IN_FEATURES), lambda i: (i, 0)),
            # Weight row, resident across all grid steps.
            pl.BlockSpec((OUT_FEATURES, IN_FEATURES), lambda i: (0, 0)),
            # Bias as a scalar in SMEM (no padded VMEM tile, no per-step DMA).
            pl.BlockSpec(memory_space=pltpu.MemorySpace.SMEM),
        ],
        # Lane-dense output: (1, tb) row per grid step.
        out_specs=pl.BlockSpec((1, tb), lambda i: (0, i)),
        compiler_params=pltpu.CompilerParams(
            dimension_semantics=("parallel",),       # megacore sharding on v7x
            vmem_limit_bytes=32 * 1024 * 1024,       # headroom for 8192-row tiles
        ),
        cost_estimate=cost,
    )(x, w, b)

    # (1, padded_b) -> (B, 1), matching the PyTorch output layout.
    return out[0, :B].reshape(B, OUT_FEATURES)


def init_params(key):
    """Deterministic init matching nn.Linear(128, 1):
    weight (1, 128), bias (1,), uniform(-1/sqrt(128), 1/sqrt(128))."""
    kw, kb = jax.random.split(key)
    bound = 1.0 / jnp.sqrt(jnp.float32(IN_FEATURES))
    w = jax.random.uniform(kw, (OUT_FEATURES, IN_FEATURES), jnp.float32,
                           minval=-bound, maxval=bound)
    b = jax.random.uniform(kb, (OUT_FEATURES,), jnp.float32,
                           minval=-bound, maxval=bound)
    return w, b


if __name__ == "__main__":
    key = jax.random.PRNGKey(0)
    k_x, k_p = jax.random.split(key)
    w, b = init_params(k_p)

    def ref_fn(xx):
        return jax.nn.sigmoid(xx @ w.T + b)

    # Small batch: single block, tb < 128 (legal because out block == full dims).
    B = 8
    x = jax.random.normal(k_x, (B, IN_FEATURES), jnp.float32)
    out = jax.block_until_ready(dhead_forward(x, w, b))
    assert out.shape == (B, OUT_FEATURES)
    assert jnp.allclose(out, ref_fn(x), atol=1e-4, rtol=1e-4)

    # Unaligned batch: partial tail block, no wrapper-side jnp.pad of x.
    B2 = 27
    x2 = jax.random.normal(jax.random.PRNGKey(1), (B2, IN_FEATURES), jnp.float32)
    out2 = jax.block_until_ready(dhead_forward(x2, w, b))
    assert out2.shape == (B2, OUT_FEATURES)
    assert jnp.allclose(out2, ref_fn(x2), atol=1e-4, rtol=1e-4)

    # Larger batch: >=2 grid steps (v7x megacore path) + partial last block.
    B3 = 300
    x3 = jax.random.normal(jax.random.PRNGKey(2), (B3, IN_FEATURES), jnp.float32)
    out3 = jax.block_until_ready(dhead_forward(x3, w, b))
    assert out3.shape == (B3, OUT_FEATURES)
    assert jnp.allclose(out3, ref_fn(x3), atol=1e-4, rtol=1e-4)

    print("KERNEL_OK")
</pallas_src>

<mosaic_0001>
module attributes {stable_mosaic.version = 11 : i64} {
  func.func @dhead_kernel(%arg0: i32, %arg1: memref<8x128xf32, #tpu.memory_space<vmem>>, %arg2: memref<1x128xf32, #tpu.memory_space<vmem>>, %arg3: memref<1xf32, #tpu.memory_space<smem>>, %arg4: memref<1x8xf32, #tpu.memory_space<vmem>>) attributes {dimension_semantics = [#tpu.dimension_semantics<parallel>], iteration_bounds = array<i64: 1>, scalar_prefetch = 0 : i64, scratch_operands = 0 : i64, tpu.core_type = #tpu.core_type<tc>, window_params = [{transform_indices = @transform_0, window_bounds = array<i64: 8, 128>}, {pipeline_mode = #tpu.pipeline_mode<synchronous>, transform_indices = @transform_1, window_bounds = array<i64: 1, 128>}, {transform_indices = @transform_2, window_bounds = array<i64: 1>}, {transform_indices = @transform_3, window_bounds = array<i64: 1, 8>}]} {
    %c0 = arith.constant 0 : index
    %c0_0 = arith.constant 0 : index
    %0 = vector.load %arg1[%c0, %c0_0] : memref<8x128xf32, #tpu.memory_space<vmem>>, vector<8x128xf32>
    %c0_1 = arith.constant 0 : index
    %c0_2 = arith.constant 0 : index
    %1 = vector.load %arg2[%c0_1, %c0_2] : memref<1x128xf32, #tpu.memory_space<vmem>>, vector<1x128xf32>
    %cst = arith.constant dense<0.000000e+00> : vector<1x8xf32>
    %2 = tpu.matmul %1, %0, %cst {dimension_numbers = #tpu.dot_dimension_numbers<[1], [1], [0], [0], [0, 0, 1, 0], [], []>, precision = #tpu.contract_precision<fp32>} : vector<1x128xf32>, vector<8x128xf32>, vector<1x8xf32> -> vector<1x8xf32>
    %c0_3 = arith.constant 0 : index
    %3 = memref.load %arg3[%c0_3] : memref<1xf32, #tpu.memory_space<smem>>
    %4 = vector.broadcast %3 : f32 to vector<1x8xf32>
    %5 = arith.addf %2, %4 : vector<1x8xf32>
    %6 = arith.negf %5 : vector<1x8xf32>
    %7 = math.exp %6 : vector<1x8xf32>
    %cst_4 = arith.constant 1.000000e+00 : f32
    %8 = vector.broadcast %cst_4 : f32 to vector<1x8xf32>
    %9 = arith.addf %8, %7 : vector<1x8xf32>
    %10 = arith.divf %8, %9 : vector<1x8xf32>
    %c0_5 = arith.constant 0 : index
    %c0_6 = arith.constant 0 : index
    %11 = vector.load %arg4[%c0_5, %c0_6] : memref<1x8xf32, #tpu.memory_space<vmem>>, vector<1x8xf32>
    tpu.vector_store %arg4[%c0_5, %c0_6], %10 {strides = array<i32>} : memref<1x8xf32, #tpu.memory_space<vmem>>, vector<1x8xf32>,
    return
  }
  func.func @transform_0(%arg0: i32) -> (i32, i32) {
    %c0_i32 = arith.constant 0 : i32
    %c0_i32_0 = arith.constant 0 : i32
    return %arg0, %c0_i32 : i32, i32
  }
  func.func @transform_1(%arg0: i32) -> (i32, i32) {
    %c0_i32 = arith.constant 0 : i32
    %c0_i32_0 = arith.constant 0 : i32
    %c0_i32_1 = arith.constant 0 : i32
    return %c0_i32, %c0_i32_0 : i32, i32
  }
  func.func @transform_2(%arg0: i32) -> i32 {
    %c0_i32 = arith.constant 0 : i32
    %c0_i32_0 = arith.constant 0 : i32
    return %c0_i32 : i32
  }
  func.func @transform_3(%arg0: i32) -> (i32, i32) {
    %c0_i32 = arith.constant 0 : i32
    %c0_i32_0 = arith.constant 0 : i32
    return %c0_i32, %arg0 : i32, i32
  }
}

</mosaic_0001>

<bundles_post_ra>
// kernel: tpu_custom_call.1
= control target key start
LH: loop header
LB: loop body
LE: loop exit
PB: predicated region body
PF: predicated region fallthrough
CT: control target
= control target key end

     0   :  { %9 = vsyncpa [#allocation4], 0  ;;  %s311_s0 = inlined_call_operand.hbm [shape: f32[8,128], index: 0, kind: input, shape index: {}]   ;;  %s312_s1 = inlined_call_operand.vmem [shape: f32[1,128], index: 1, kind: input, shape index: {}]   ;;  %s313_s2 = inlined_call_operand.<no memory space> [shape: f32[1], index: 2, kind: input, shape index: {}]   ;;  %s314_s3 = inlined_call_operand.hbm [shape: f32[1,8], index: 3, kind: output, shape index: {}]  }
   0x1   :  { %10 = vsyncpa [#allocation5], 0  ;;  %s16_s14 = sshll.u32 %s311_s0, 4  ;;  %s277_s15 = smov [#allocation3]   ;;  %s17_s14 = int_to_ptr.hbm [resolvable:$true] %s16_s14 }
   0x2   :  { %s18_s16 = sshll.u32 %s277_s15, 4  ;;  %s19_s16 = int_to_ptr.vmem [resolvable:$true] %s18_s16 }
   0x3   :  { %21 = dma.hbm_to_vmem [thread:$0]  %s17_s14, 128, %s19_s16, [#allocation4]  }
   0x4   :  { %273 = dma.done.wait [#allocation4], 128  }
   0x5   :  { %274 = vsyncadd [#allocation4], 4294967168  ;;  %v30_v0 = vld [vmem:[#allocation3] sm:$0xff]  ;;  %v33_v12 = vstv %s313_s2  ;;  %s278_s2 = smov [#allocation6]   ;;  %s208_s22 = sshll.u32 %s314_s3, 4  ;;  %vm199_vm3 = vcmask 57344   ;;  %s209_s22 = int_to_ptr.hbm [resolvable:$true] %s208_s22 }
   0x6   :  { %v31_v1 = vld [vmem:[%s312_s1] sm:$0x1]  ;;  %v49_v2 = vand.u32 4294901760, %v30_v0  ;;  %s206_s19 = sshll.u32 %s278_s2, 4  ;;  %s207_s19 = int_to_ptr.vmem [resolvable:$true] %s206_s19 }
   0x7   :  { %v51_v3 = vand.u32 4294901760, %v31_v1 }
   0x8   :  { %v76_v4 = vsub.f32 %v30_v0, %v49_v2  ;;  %50 = vmatpush.xpose.msra.mxu0 %v49_v2  ;;  %126 = vmatpush.xpose.msra.mxu3 %v49_v2 }
   0x9   :  { %v52_v5 = vsub.f32 %v31_v1, %v51_v3 }
   0xa   :  { %103 = vmatpush.xpose.msra.mxu2 %v76_v4  ;;  %v77_v6 = vand.u32 4294901760, %v76_v4 }
   0xb   :  { %v53_v7 = vand.u32 4294901760, %v52_v5 }
   0xc   :  { %v78_v8 = vsub.f32 %v76_v4, %v77_v6  ;;  %152 = vmatpush.xpose.msrb.mxu0 %v77_v6 }
   0xd   :  { %v54_v9 = vsub.f32 %v52_v5, %v53_v7  ;;  %130 = vmatmul.f32.vlgmr.msra.gmra.mxu3 %v53_v7  ;;  %106 = vmatmul.f32.vlgmr.msra.gmra.mxu2 %v52_v5 }
   0xe   :  { %v79_v10 = vand.u32 4294901760, %v78_v8 }
   0xf   :  { %v55_v11 = vand.u32 4294901760, %v54_v9 }
  0x10   :  { %80 = vmatpush.xpose.msra.mxu1 %v79_v10 }
  0x11   :  { %56 = vmatmul.f32.vlgmr.msra.gmra.mxu0 %v55_v11 }
  0x13   :  { %82 = vmatmul.f32.vlgmr.msra.gmra.mxu1 %v51_v3 }
  0x14   :  { %174 = vmatpush.xpose.msrb.mxu1 %v49_v2 }
  0x19   :  { %154 = vmatmul.f32.vlgmr.msrb.gmra.mxu0 %v51_v3 }
  0x1b   :  { %176 = vmatmul.f32.vlgmr.msrb.gmra.mxu1 %v51_v3 }
  0x8e   :  { %v57_v13 = vpop.f32.mrf.mxu0 }
  0x8f   :  { %v58_v14 = vadd.f32 %v57_v13, %v33_v12 }
  0x90   :  { %v83_v15 = vpop.f32.mrf.mxu1  ;;  %v107_v16 = vpop.f32.mrf.mxu2 }
  0x91   :  { %v84_v17 = vadd.f32 %v83_v15, %v58_v14  ;;  %v131_v18 = vpop.f32.mrf.mxu3 }
  0x93   :  { %v108_v19 = vadd.f32 %v107_v16, %v84_v17 }
  0x95   :  { %v132_v20 = vadd.f32 %v131_v18, %v108_v19 }
  0x96   :  { %v155_v21 = vpop.f32.mrf.mxu0 }
  0x97   :  { %v156_v22 = vadd.f32 %v155_v21, %v132_v20 }
  0x98   :  { %v177_v23 = vpop.f32.mrf.mxu1 }
  0x99   :  { %v178_v24 = vadd.f32 %v177_v23, %v156_v22 }
  0x9b   :  { %v218_v25 = vmul.f32 -1.442695, %v178_v24 }
  0x9d   :  { %221 = vpow2.f32 %v218_v25 }
  0xa3   :  { %v222_v26 = vpop.eup %221 }
  0xa4   :  { %v183_v27 = vadd.f32 1.0, %v222_v26 }
  0xa6   :  { %223 = vrcp.f32 %v183_v27  ;;  %v195_v31 = vand.u32 2147483648, %v183_v27  ;;  %v193_v33 = vand.u32 2147483647, %v183_v27  ;;  %vm189_vm1 = vweird.f32 %v183_v27 }
  0xa8   :  { %v196_v35 = vor.u32 1.1754944e-38, %v195_v31  ;;  %vm194_vm4 = vcmp.eq.f32.partialorder %v193_v33, 8.507059e+37 }
  0xac   :  { %v224_v28 = vpop.eup %223 }
  0xad   :  { %v185_v29 = vmul.f32 %v224_v28, %v183_v27  ;;  %vm190_vm0 = vweird.f32 %v224_v28 }
  0xae   :  { %vm191_vm2 = vmor %vm189_vm1, %vm190_vm0 }
  0xaf   :  { %v186_v30 = vsub.f32 1.0, %v185_v29 }
  0xb1   :  { %v187_v32 = vmul.f32 %v224_v28, %v186_v30 }
  0xb3   :  { %v188_v34 = vadd.f32 %v224_v28, %v187_v32 }
  0xb5   :  { %v192_v36 = vsel %vm191_vm2, %v224_v28, %v188_v34 }
  0xb6   :  { %v197_v37 = vsel %vm194_vm4, %v196_v35, %v192_v36 }
  0xb7   :  { %200 = vst.msk [vmem:[#allocation6] sm:$0x1] %vm199_vm3, %v197_v37 }
  0xb8   :  { %211 = dma.vmem_to_hbm [thread:$0]  %s207_s19, 16, %s209_s22, [#allocation5]  }
  0xb9   :  { %275 = dma.done.wait [#allocation5], 16  }
  0xba   :  { %276 = vsyncadd [#allocation5], 4294967280 }
  0xbb   :  { %216 = vsyncpa [#allocation4], 1 }
  0xbc   :  { %217 = vsyncpa [#allocation5], 1 }

</bundles_post_ra>
